<compile_context>
chip_gen: v7x
topology: tpu7x:2x2x1
jax: 0.10.0
libtpu: 0.0.40
codegen_flags: <defaults>
</compile_context>

<pallas_src>
import functools

import jax
import jax.numpy as jnp
import numpy as np
from jax.experimental import pallas as pl
from jax.experimental.pallas import tpu as pltpu


def _cheb_kernel(x_ref, att_ref, cheb_t_ref, theta_blk_ref, o_ref, *, K):
    # x_ref:         (1, N, F_in*T)        one batch, all timesteps (t fastest)
    # att_ref:       (1, N, N)             spatial attention for this batch
    # cheb_t_ref:    (K, N, N)             transposed Chebyshev polynomials
    # theta_blk_ref: (K, F_in*T, F_out*T)  block-diagonal-expanded Theta
    # o_ref:         (1, N, F_out*T)
    x = x_ref[0]                               # (N, F_in*T)
    att_t = att_ref[0].T                       # (N, N), transposed once per batch

    n = x.shape[0]
    fout_t = theta_blk_ref.shape[-1]
    acc = jnp.zeros((n, fout_t), dtype=jnp.float32)

    for k in range(K):                         # K small & static -> unrolled
        # (T_k * att).T == T_k.T * att.T  -- elementwise, once per batch.
        a_kt = cheb_t_ref[k] * att_t                                   # (N, N)
        # Graph propagation over all timesteps at once: lanes = F_in*T.
        r_k = jnp.dot(a_kt, x, preferred_element_type=jnp.float32)     # (N, F_in*T)
        # Feature projection via block-diagonal Theta: lanes = F_out*T.
        acc = acc + jnp.dot(r_k, theta_blk_ref[k],
                            preferred_element_type=jnp.float32)        # (N, F_out*T)

    o_ref[0] = jnp.maximum(acc, 0.0).astype(o_ref.dtype)


def cheb_conv_with_sat(x, spatial_attention, cheb_polys, theta):
    """
    x:                 (B, N, F_in, T)  float32
    spatial_attention: (B, N, N)        float32
    cheb_polys:        (K, N, N)        float32
    theta:             (K, F_in, F_out) float32
    returns:           (B, N, F_out, T) float32
    """
    B, N, F_in, T = x.shape
    K = cheb_polys.shape[0]
    F_out = theta.shape[-1]

    # Free row-major reshape (no HBM transpose pass): trailing (F_in, T) -> F_in*T.
    x_flat = x.reshape(B, N, F_in * T)

    # One-time, tiny preprocessing of the constant weights.
    cheb_t = jnp.transpose(cheb_polys, (0, 2, 1))                      # (K, N, N)
    # theta_blk[k, f*T + s, o*T + t] = theta[k, f, o] * (s == t)
    eye_t = jnp.eye(T, dtype=theta.dtype)
    theta_blk = jnp.einsum("kfo,st->kfsot", theta, eye_t).reshape(
        K, F_in * T, F_out * T)

    kernel = functools.partial(_cheb_kernel, K=K)

    out_flat = pl.pallas_call(
        kernel,
        out_shape=jax.ShapeDtypeStruct((B, N, F_out * T), jnp.float32),
        grid_spec=pltpu.PrefetchScalarGridSpec(
            num_scalar_prefetch=0,
            grid=(B,),
            in_specs=[
                pl.BlockSpec((1, N, F_in * T), lambda b: (b, 0, 0)),
                pl.BlockSpec((1, N, N), lambda b: (b, 0, 0)),
                pl.BlockSpec((K, N, N), lambda b: (0, 0, 0)),
                pl.BlockSpec((K, F_in * T, F_out * T), lambda b: (0, 0, 0)),
            ],
            out_specs=pl.BlockSpec((1, N, F_out * T), lambda b: (b, 0, 0)),
        ),
        compiler_params=pltpu.CompilerParams(
            # Batch axis is embarrassingly parallel -> shards across the two
            # TensorCores on v7x; a no-op on single-TC v5e/v6e.
            dimension_semantics=("parallel",),
            # Explicit VMEM budget: fits v7x's 64 MiB as well as v5e/v6e's
            # 128 MiB while leaving room for double-buffered operands.
            vmem_limit_bytes=64 * 1024 * 1024,
        ),
    )(x_flat, spatial_attention, cheb_t, theta_blk)

    # Free row-major reshape back to the PyTorch (B, N, F_out, T) convention.
    return out_flat.reshape(B, N, F_out, T)


def _reference(x, spatial_attention, cheb_polys, theta):
    """Pure-JAX reference mirroring the PyTorch loop."""
    B, N, F_in, T = x.shape
    K = cheb_polys.shape[0]
    F_out = theta.shape[-1]
    outs = []
    for t in range(T):
        gs = x[:, :, :, t]                                    # (B, N, F_in)
        out = jnp.zeros((B, N, F_out), jnp.float32)
        for k in range(K):
            t_k_at = cheb_polys[k][None] * spatial_attention  # (B, N, N)
            rhs = jnp.einsum("bnm,bnf->bmf", t_k_at, gs)      # (B, N, F_in)
            out = out + rhs @ theta[k]
        outs.append(out[..., None])
    return jax.nn.relu(jnp.concatenate(outs, axis=-1))


if __name__ == "__main__":
    # Small, deterministic example shapes.
    B, N, F_in, F_out, T, K = 2, 16, 4, 8, 8, 3

    key = jax.random.PRNGKey(0)
    k_x, k_adj, k_att, k_theta = jax.random.split(key, 4)

    # Inputs.
    x = jax.random.normal(k_x, (B, N, F_in, T), dtype=jnp.float32)
    spatial_attention = jax.nn.softmax(
        jax.random.normal(k_att, (B, N, N), dtype=jnp.float32), axis=-1)

    # Deterministic Chebyshev polynomials from a random scaled Laplacian.
    adj = jax.random.uniform(k_adj, (N, N), dtype=jnp.float32)
    adj = (adj + adj.T) * 0.5
    deg = jnp.diag(jnp.sum(adj, axis=1))
    lap = deg - adj
    lam_max = jnp.max(jnp.linalg.eigvalsh(lap))
    l_tilde = (2.0 / lam_max) * lap - jnp.eye(N, dtype=jnp.float32)
    chebs = [jnp.eye(N, dtype=jnp.float32), l_tilde]
    for _ in range(2, K):
        chebs.append(2.0 * l_tilde @ chebs[-1] - chebs[-2])
    cheb_polys = jnp.stack(chebs[:K], axis=0)           # (K, N, N)

    # Theta parameters (deterministic init in place of nn.Parameter).
    theta = 0.1 * jax.random.normal(k_theta, (K, F_in, F_out),
                                    dtype=jnp.float32)

    out = jax.block_until_ready(
        cheb_conv_with_sat(x, spatial_attention, cheb_polys, theta))

    ref = _reference(x, spatial_attention, cheb_polys, theta)
    assert out.shape == (B, N, F_out, T)
    np.testing.assert_allclose(np.asarray(out), np.asarray(ref),
                               rtol=1e-5, atol=1e-5)
    print("KERNEL_OK")
</pallas_src>

<mosaic_0001>
module attributes {stable_mosaic.version = 11 : i64} {
  func.func @_cheb_kernel(%arg0: i32, %arg1: memref<1x16x32xf32, #tpu.memory_space<vmem>>, %arg2: memref<1x16x16xf32, #tpu.memory_space<vmem>>, %arg3: memref<3x16x16xf32, #tpu.memory_space<vmem>>, %arg4: memref<3x32x64xf32, #tpu.memory_space<vmem>>, %arg5: memref<1x16x64xf32, #tpu.memory_space<vmem>>) attributes {dimension_semantics = [#tpu.dimension_semantics<parallel>], iteration_bounds = array<i64: 2>, scalar_prefetch = 0 : i64, scratch_operands = 0 : i64, tpu.core_type = #tpu.core_type<tc>, window_params = [{transform_indices = @transform_0, window_bounds = array<i64: 1, 16, 32>}, {transform_indices = @transform_1, window_bounds = array<i64: 1, 16, 16>}, {pipeline_mode = #tpu.pipeline_mode<synchronous>, transform_indices = @transform_2, window_bounds = array<i64: 3, 16, 16>}, {pipeline_mode = #tpu.pipeline_mode<synchronous>, transform_indices = @transform_3, window_bounds = array<i64: 3, 32, 64>}, {transform_indices = @transform_4, window_bounds = array<i64: 1, 16, 64>}]} {
    %c0 = arith.constant 0 : index
    %c0_0 = arith.constant 0 : index
    %c0_1 = arith.constant 0 : index
    %0 = vector.load %arg1[%c0, %c0_0, %c0_1] : memref<1x16x32xf32, #tpu.memory_space<vmem>>, vector<1x16x32xf32>
    %1 = vector.shape_cast %0 : vector<1x16x32xf32> to vector<16x32xf32>
    %c0_2 = arith.constant 0 : index
    %c0_3 = arith.constant 0 : index
    %c0_4 = arith.constant 0 : index
    %2 = vector.load %arg2[%c0_2, %c0_3, %c0_4] : memref<1x16x16xf32, #tpu.memory_space<vmem>>, vector<1x16x16xf32>
    %3 = vector.shape_cast %2 : vector<1x16x16xf32> to vector<16x16xf32>
    %4 = tpu.transpose %3, [1, 0] : vector<16x16xf32> -> vector<16x16xf32>
    %cst = arith.constant 0.000000e+00 : f32
    %5 = vector.broadcast %cst : f32 to vector<16x64xf32>
    %c0_5 = arith.constant 0 : index
    %c0_6 = arith.constant 0 : index
    %c0_7 = arith.constant 0 : index
    %6 = vector.load %arg3[%c0_5, %c0_6, %c0_7] : memref<3x16x16xf32, #tpu.memory_space<vmem>>, vector<1x16x16xf32>
    %7 = vector.shape_cast %6 : vector<1x16x16xf32> to vector<16x16xf32>
    %8 = arith.mulf %7, %4 : vector<16x16xf32>
    %cst_8 = arith.constant dense<0.000000e+00> : vector<16x32xf32>
    %9 = tpu.matmul %8, %1, %cst_8 {dimension_numbers = #tpu.dot_dimension_numbers<[1], [0], [0], [1], [0, 0, 1, 1], [], []>} : vector<16x16xf32>, vector<16x32xf32>, vector<16x32xf32> -> vector<16x32xf32>
    %c0_9 = arith.constant 0 : index
    %c0_10 = arith.constant 0 : index
    %c0_11 = arith.constant 0 : index
    %10 = vector.load %arg4[%c0_9, %c0_10, %c0_11] : memref<3x32x64xf32, #tpu.memory_space<vmem>>, vector<1x32x64xf32>
    %11 = vector.shape_cast %10 : vector<1x32x64xf32> to vector<32x64xf32>
    %cst_12 = arith.constant dense<0.000000e+00> : vector<16x64xf32>
    %12 = tpu.matmul %9, %11, %cst_12 {dimension_numbers = #tpu.dot_dimension_numbers<[1], [0], [0], [1], [0, 0, 1, 1], [], []>} : vector<16x32xf32>, vector<32x64xf32>, vector<16x64xf32> -> vector<16x64xf32>
    %13 = arith.addf %5, %12 : vector<16x64xf32>
    %c1 = arith.constant 1 : index
    %c0_13 = arith.constant 0 : index
    %c0_14 = arith.constant 0 : index
    %14 = vector.load %arg3[%c1, %c0_13, %c0_14] : memref<3x16x16xf32, #tpu.memory_space<vmem>>, vector<1x16x16xf32>
    %15 = vector.shape_cast %14 : vector<1x16x16xf32> to vector<16x16xf32>
    %16 = arith.mulf %15, %4 : vector<16x16xf32>
    %cst_15 = arith.constant dense<0.000000e+00> : vector<16x32xf32>
    %17 = tpu.matmul %16, %1, %cst_15 {dimension_numbers = #tpu.dot_dimension_numbers<[1], [0], [0], [1], [0, 0, 1, 1], [], []>} : vector<16x16xf32>, vector<16x32xf32>, vector<16x32xf32> -> vector<16x32xf32>
    %c1_16 = arith.constant 1 : index
    %c0_17 = arith.constant 0 : index
    %c0_18 = arith.constant 0 : index
    %18 = vector.load %arg4[%c1_16, %c0_17, %c0_18] : memref<3x32x64xf32, #tpu.memory_space<vmem>>, vector<1x32x64xf32>
    %19 = vector.shape_cast %18 : vector<1x32x64xf32> to vector<32x64xf32>
    %cst_19 = arith.constant dense<0.000000e+00> : vector<16x64xf32>
    %20 = tpu.matmul %17, %19, %cst_19 {dimension_numbers = #tpu.dot_dimension_numbers<[1], [0], [0], [1], [0, 0, 1, 1], [], []>} : vector<16x32xf32>, vector<32x64xf32>, vector<16x64xf32> -> vector<16x64xf32>
    %21 = arith.addf %13, %20 : vector<16x64xf32>
    %c2 = arith.constant 2 : index
    %c0_20 = arith.constant 0 : index
    %c0_21 = arith.constant 0 : index
    %22 = vector.load %arg3[%c2, %c0_20, %c0_21] : memref<3x16x16xf32, #tpu.memory_space<vmem>>, vector<1x16x16xf32>
    %23 = vector.shape_cast %22 : vector<1x16x16xf32> to vector<16x16xf32>
    %24 = arith.mulf %23, %4 : vector<16x16xf32>
    %cst_22 = arith.constant dense<0.000000e+00> : vector<16x32xf32>
    %25 = tpu.matmul %24, %1, %cst_22 {dimension_numbers = #tpu.dot_dimension_numbers<[1], [0], [0], [1], [0, 0, 1, 1], [], []>} : vector<16x16xf32>, vector<16x32xf32>, vector<16x32xf32> -> vector<16x32xf32>
    %c2_23 = arith.constant 2 : index
    %c0_24 = arith.constant 0 : index
    %c0_25 = arith.constant 0 : index
    %26 = vector.load %arg4[%c2_23, %c0_24, %c0_25] : memref<3x32x64xf32, #tpu.memory_space<vmem>>, vector<1x32x64xf32>
    %27 = vector.shape_cast %26 : vector<1x32x64xf32> to vector<32x64xf32>
    %cst_26 = arith.constant dense<0.000000e+00> : vector<16x64xf32>
    %28 = tpu.matmul %25, %27, %cst_26 {dimension_numbers = #tpu.dot_dimension_numbers<[1], [0], [0], [1], [0, 0, 1, 1], [], []>} : vector<16x32xf32>, vector<32x64xf32>, vector<16x64xf32> -> vector<16x64xf32>
    %29 = arith.addf %21, %28 : vector<16x64xf32>
    %cst_27 = arith.constant 0.000000e+00 : f32
    %30 = vector.broadcast %cst_27 : f32 to vector<16x64xf32>
    %31 = arith.maximumf %29, %30 : vector<16x64xf32>
    %c0_28 = arith.constant 0 : index
    %c0_29 = arith.constant 0 : index
    %c0_30 = arith.constant 0 : index
    %32 = vector.load %arg5[%c0_28, %c0_29, %c0_30] : memref<1x16x64xf32, #tpu.memory_space<vmem>>, vector<1x16x64xf32>
    %33 = vector.shape_cast %32 : vector<1x16x64xf32> to vector<16x64xf32>
    %34 = vector.shape_cast %31 : vector<16x64xf32> to vector<1x16x64xf32>
    tpu.vector_store %arg5[%c0_28, %c0_29, %c0_30], %34 {strides = array<i32>} : memref<1x16x64xf32, #tpu.memory_space<vmem>>, vector<1x16x64xf32>,
    return
  }
  func.func @transform_0(%arg0: i32) -> (i32, i32, i32) {
    %c0_i32 = arith.constant 0 : i32
    %c0_i32_0 = arith.constant 0 : i32
    %c0_i32_1 = arith.constant 0 : i32
    return %arg0, %c0_i32, %c0_i32_0 : i32, i32, i32
  }
  func.func @transform_1(%arg0: i32) -> (i32, i32, i32) {
    %c0_i32 = arith.constant 0 : i32
    %c0_i32_0 = arith.constant 0 : i32
    %c0_i32_1 = arith.constant 0 : i32
    return %arg0, %c0_i32, %c0_i32_0 : i32, i32, i32
  }
  func.func @transform_2(%arg0: i32) -> (i32, i32, i32) {
    %c0_i32 = arith.constant 0 : i32
    %c0_i32_0 = arith.constant 0 : i32
    %c0_i32_1 = arith.constant 0 : i32
    %c0_i32_2 = arith.constant 0 : i32
    return %c0_i32, %c0_i32_0, %c0_i32_1 : i32, i32, i32
  }
  func.func @transform_3(%arg0: i32) -> (i32, i32, i32) {
    %c0_i32 = arith.constant 0 : i32
    %c0_i32_0 = arith.constant 0 : i32
    %c0_i32_1 = arith.constant 0 : i32
    %c0_i32_2 = arith.constant 0 : i32
    return %c0_i32, %c0_i32_0, %c0_i32_1 : i32, i32, i32
  }
  func.func @transform_4(%arg0: i32) -> (i32, i32, i32) {
    %c0_i32 = arith.constant 0 : i32
    %c0_i32_0 = arith.constant 0 : i32
    %c0_i32_1 = arith.constant 0 : i32
    return %arg0, %c0_i32, %c0_i32_0 : i32, i32, i32
  }
}

</mosaic_0001>

<bundles_post_ra>
// kernel: tpu_custom_call.1
= control target key start
LH: loop header
LB: loop body
LE: loop exit
PB: predicated region body
PF: predicated region fallthrough
CT: control target
= control target key end

     0   :  { %s1750_s0 = inlined_call_operand.hbm [shape: f32[2,16,32], index: 0, kind: input, shape index: {}]   ;;  %s1751_s1 = inlined_call_operand.hbm [shape: f32[2,16,16], index: 1, kind: input, shape index: {}]   ;;  %s1752_s2 = inlined_call_operand.hbm [shape: f32[3,16,16], index: 2, kind: input, shape index: {}]   ;;  %s1753_s3 = inlined_call_operand.hbm [shape: f32[3,32,64], index: 3, kind: input, shape index: {}]   ;;  %s1754_s4 = inlined_call_operand.hbm [shape: f32[2,16,64], index: 4, kind: output, shape index: {}]  }
   0x1   :  { %1762 = sst [smem:[#allocation16_spill]] %s1750_s0 }
   0x2   :  { %9 = vsyncpa [#allocation3], 0 }
   0x3   :  { %11 = vsyncpa [#allocation3 + $0x1], 0 }
   0x4   :  { %12 = vsyncpa [#allocation6], 0 }
   0x5   :  { %14 = vsyncpa [#allocation6 + $0x1], 0 }
   0x6   :  { %15 = vsyncpa [#allocation9], 0 }
   0x7   :  { %16 = vsyncpa [#allocation4], 0 }
   0x8   :  { %18 = vsyncpa [#allocation4 + $0x1], 0  ;;  %s1441_s15 = smov 0   ;;  %s1443_s16 = smov 0  }
   0x9   :  { %s1445_s17 = smov 0   ;;  %s1447_s18 = smov 0  }
   0xa LB: > { %s1462_s19 = sadd.s32 4294967295, %s1405_s18   ;;  %s973_s20 = sadd.s32 4294967294, %s1405_s18   ;;  %s1405_s18 = sphi %s1447_s18, %s1784_s18   ;;  %s1401_s17 = sphi %s1445_s17, %s1783_s17   ;;  %s1397_s16 = sphi %s1443_s16, %s1782_s16   ;;  %s1393_s15 = sphi %s1441_s15, %s1781_s15  }
   0xb   : > { %p44_p0 = scmp.ne.s32.totalorder %s1397_s16, %s1393_s15  ;;  %p1755_p1 = scmp.eq.s32.totalorder %s1462_s19, 0 }
   0xc   : > { %p142_p3 = scmp.eq.s32.totalorder %s973_s20, 1  ;;  %p974_p5 = scmp.ge.s32.totalorder %s1405_s18, 1 }
   0xd   : > { %p1471_p4 = por %p1755_p1, %p44_p0  ;;  %p149_p7 = scmp.lt.s32.totalorder %s1405_s18, 3 }
   0xe   : > { %p1476_p6 = por %p142_p3, %p44_p0  ;;  %s1407_s24 = smov [#allocation7]  }
   0xf   : > { %s1763_s21 = scalar_select %p1471_p4, 1, 0 }
  0x10   : > { %s1764_s22 = scalar_select %p1476_p6, 1, 0 }
  0x11   : > { %p1481_p8 = pnand %p974_p5, %p149_p7  ;;  %s161_s25 = sshll.u32 %s1407_s24, 4  ;;  %s1485_s25 = int_to_ptr.vmem [resolvable:$true] %s161_s25 }
  0x12   : > { %s1408_s27 = smov [#allocation8]   ;;  %s1211_s5 = scalar_lea.hbm %s1752_s2, 768 }
  0x13   : > { %p1148_p9 = pneg %p1481_p8  ;;  %s174_s28 = sshll.u32 %s1408_s27, 4  ;;  %s1496_s28 = int_to_ptr.vmem [resolvable:$true] %s174_s28 }
  0x14   : > { %p1212_p12 = scmp.ne.s32.totalorder %s1752_s2, %s1211_s5  ;;  %p1218_p5 = scmp.lt.u32.totalorder %s1211_s5, %s1752_s2 }
  0x15   : > { %p1492_p11 = pnand %p1148_p9, %p1755_p1 }
  0x17   : > { %p1213_p13 = pneg %p1492_p11 }
  0x19   : > { %p1214_p0 = pnand %p1213_p13, %p1212_p12 }
  0x1b   : > { %p1215_p3 = pneg %p1214_p0 }
  0x1d   : > { %p1220_p7 = pnand %p1218_p5, %p1215_p3 }
  0x1f   : > { %1223 = shalt.err (!%p1220_p7)
}
  0x20   : > { %s1224_s10 = scalar_lea.vmem %s1485_s25, 768  ;;  %p1232_p2 = scmp.lt.s32.totalorder %s1485_s25, %s1485_s25 }
  0x21   : > { %p1225_p9 = scmp.ne.s32.totalorder %s1485_s25, %s1224_s10  ;;  %p1233_p12 = scmp.lt.s32.totalorder %s1224_s10, %s1224_s10 }
  0x23   : > { %p1227_p10 = pnand %p1225_p9, %p1213_p13  ;;  %p1234_p0 = por %p1233_p12, %p1232_p2 }
  0x25   : > { %p1228_p1 = pneg %p1227_p10 }
  0x27   : > { %p1235_p6 = pnand %p1234_p0, %p1228_p1 }
  0x29   : > { %1238 = shalt.err (!%p1235_p6)
}
  0x2a   : > { %s1756_s11 = smov 128   ;;  %s1758_s12 = smov 8  }
  0x2b   : > { %1151 = dma.hbm_to_vmem [thread:$0]  (!%p1492_p11), %s1752_s2, 768, %s1485_s25, [#allocation6], %s1756_s11, %s1756_s11, %s1758_s12  }
  0x2c   : > { %s1239_s27 = scalar_lea.hbm %s1753_s3, 1536 }
  0x2d   : > { %p1240_p1 = scmp.ne.s32.totalorder %s1753_s3, %s1239_s27  ;;  %p1246_p10 = scmp.lt.u32.totalorder %s1239_s27, %s1753_s3 }
  0x2f   : > { %p1242_p2 = pnand %p1240_p1, %p1213_p13 }
  0x31   : > { %p1243_p6 = pneg %p1242_p2 }
  0x33   : > { %p1248_p3 = pnand %p1246_p10, %p1243_p6 }
  0x35   : > { %1251 = shalt.err (!%p1248_p3)
}
  0x36   : > { %s1252_s25 = scalar_lea.vmem %s1496_s28, 1536  ;;  %p1260_p12 = scmp.lt.s32.totalorder %s1496_s28, %s1496_s28 }
  0x37   : > { %p1253_p5 = scmp.ne.s32.totalorder %s1496_s28, %s1252_s25  ;;  %p1261_p0 = scmp.lt.s32.totalorder %s1252_s25, %s1252_s25 }
  0x39   : > { %p1255_p7 = pnand %p1253_p5, %p1213_p13  ;;  %p1262_p1 = por %p1261_p0, %p1260_p12 }
  0x3b   : > { %p1256_p9 = pneg %p1255_p7 }
  0x3d   : > { %p1263_p2 = pnand %p1262_p1, %p1256_p9 }
  0x3f   : > { %1266 = shalt.err (!%p1263_p2)
}
  0x40   : > { %1154 = dma.hbm_to_vmem [thread:$0]  (!%p1492_p11), %s1753_s3, 1536, %s1496_s28, [#allocation9], %s1756_s11, %s1756_s11, %s1758_s12  }
  0x41   : > { %s1557_s26 = sadd.s32 1, %s1405_s18   ;;  %s31_s9 = sadd.s32 1, %s1401_s17 }
  0x42   : > { %s28_s10 = ssub.s32 %s1405_s18, %s1557_s26  ;;  %p38_p13 = scmp.ne.s32.totalorder %s1401_s17, %s1397_s16 }
  0x43   : > { %p29_p6 = scmp.eq.s32.totalorder %s28_s10, 0  ;;  %p39_p10 = scmp.eq.s32.totalorder %s1405_s18, 0 }
  0x44   : > { %p1767_p3 = scmp.eq.s32.totalorder %s1462_s19, 1  ;;  %p1168_p7 = scmp.lt.s32.totalorder %s1405_s18, 2 }
  0x45   : > { %s1573_s14 = scalar_select %p29_p6, %s1401_s17, %s31_s9  }
  0x46   : > { %p1567_p5 = por %p1767_p3, %p38_p13  ;;  %p40_p9 = por %p39_p10, %p38_p13 }
  0x47   : > { %s188_s20 = sand.u32 1, %s1401_s17   ;;  %s1007_s28 = sshll.u32 %s1405_s18, 8 }
  0x48   : > { %s1768_s13 = scalar_select %p1567_p5, 1, 0 }
  0x49   : > { %s978_s24 = sshll.u32 %s188_s20, 4  ;;  %s1769_s0 = sld [smem:[#allocation16_spill]] }
  0x4a   : > { %s192_s5 = scalar_lea.vmem [#allocation2], %s978_s24  ;;  %p1584_p11 = pnand %p1168_p7, %p40_p9 }
  0x4b   : > { %s199_s6 = sshll.u32 %s192_s5, 4  ;;  %s1591_s9 = scalar_lea.hbm %s1751_s1, %s1007_s28  ;;  %s1582_s6 = int_to_ptr.vmem [resolvable:$true] %s199_s6 }
  0x4c   : > { %s213_s10 = scalar_lea.vmem [#allocation5], %s978_s24  ;;  %s1595_s29 = scalar_lea.sflag [#allocation3], %s188_s20 }
  0x4d   : > { %s1593_s27 = sshll.u32 %s213_s10, 4  ;;  %p1269_p0 = pneg %p1584_p11  ;;  %s1627_s27 = int_to_ptr.vmem [resolvable:$true] %s1593_s27 }
  0x4f   : > { %s1580_s30 = scalar_lea.hbm %s1769_s0, %s1007_s28  ;;  %s1272_s7 = scalar_lea.hbm %s1769_s0, 512 }
  0x50   : > { %s1267_s5 = scalar_lea.hbm %s1580_s30, 256  ;;  %p1273_p13 = scmp.lt.u32.totalorder %s1580_s30, %s1769_s0 }
  0x51   : > { %p1268_p12 = scmp.ne.s32.totalorder %s1580_s30, %s1267_s5  ;;  %p1274_p6 = scmp.lt.u32.totalorder %s1272_s7, %s1267_s5 }
  0x52   : > { %p1276_p3 = scmp.lt.u32.totalorder %s1267_s5, %s1580_s30 }
  0x53   : > { %p1270_p1 = pnand %p1269_p0, %p1268_p12  ;;  %p1275_p10 = por %p1274_p6, %p1273_p13 }
  0x55   : > { %p1271_p2 = pneg %p1270_p1  ;;  %p1277_p7 = por %p1276_p3, %p1275_p10 }
  0x57   : > { %p1278_p9 = pnand %p1277_p7, %p1271_p2 }
  0x59   : > { %1281 = shalt.err (!%p1278_p9)
}
  0x5a   : > { %s1282_s20 = scalar_lea.vmem %s1582_s6, 256  ;;  %s1411_s11 = smov [#allocation2]  }
  0x5b   : > { %p1283_p12 = scmp.ne.s32.totalorder %s1582_s6, %s1282_s20  ;;  %s1287_s12 = sshll.u32 %s1411_s11, 4  ;;  %s1288_s12 = int_to_ptr.vmem [resolvable:$false] %s1287_s12 }
  0x5c   : > { %s1289_s24 = scalar_lea.vmem %s1288_s12, 512  ;;  %p1290_p4 = scmp.lt.s32.totalorder %s1582_s6, %s1288_s12 }
  0x5d   : > { %p1285_p1 = pnand %p1283_p12, %p1269_p0  ;;  %p1291_p13 = scmp.lt.s32.totalorder %s1289_s24, %s1282_s20 }
  0x5f   : > { %p1286_p5 = pneg %p1285_p1  ;;  %p1292_p6 = por %p1291_p13, %p1290_p4 }
  0x61   : > { %p1293_p10 = pnand %p1292_p6, %p1286_p5 }
  0x63   : > { %1296 = shalt.err (!%p1293_p10)
}
  0x64   : > { %s1771_s10 = smov 8   ;;  %s1772_s5 = smov 128  }
  0x65   : > { %1158 = dma.hbm_to_vmem [thread:$0]  (!%p1584_p11), %s1580_s30, 256, %s1582_s6, %s1595_s29, %s1772_s5, %s1772_s5, %s1771_s10  }
  0x66   : > { %s209_s7 = sand.u32 1, %s1405_s18   ;;  %s1297_s28 = scalar_lea.hbm %s1591_s9, 256 }
  0x67   : > { %s1630_s8 = scalar_lea.sflag [#allocation6], %s209_s7  ;;  %p1298_p4 = scmp.ne.s32.totalorder %s1591_s9, %s1297_s28 }
  0x68   : > { %s1302_s12 = scalar_lea.hbm %s1751_s1, 512  ;;  %p1303_p3 = scmp.lt.u32.totalorder %s1591_s9, %s1751_s1 }
  0x69   : > { %p1300_p5 = pnand %p1298_p4, %p1269_p0  ;;  %p1304_p7 = scmp.lt.u32.totalorder %s1302_s12, %s1297_s28 }
  0x6a   : > { %p1306_p12 = scmp.lt.u32.totalorder %s1297_s28, %s1591_s9 }
  0x6b   : > { %p1301_p2 = pneg %p1300_p5  ;;  %p1305_p9 = por %p1304_p7, %p1303_p3 }
  0x6d   : > { %p1307_p1 = por %p1306_p12, %p1305_p9 }
  0x6f   : > { %p1308_p13 = pnand %p1307_p1, %p1301_p2 }
  0x71   : > { %1311 = shalt.err (!%p1308_p13)
}
  0x72   : > { %s1312_s30 = scalar_lea.vmem %s1627_s27, 256  ;;  %s1412_s6 = smov [#allocation5]  }
  0x73   : > { %p1313_p6 = scmp.ne.s32.totalorder %s1627_s27, %s1312_s30  ;;  %s1317_s29 = sshll.u32 %s1412_s6, 4  ;;  %s1318_s29 = int_to_ptr.vmem [resolvable:$false] %s1317_s29 }
  0x74   : > { %s1319_s0 = scalar_lea.vmem %s1318_s29, 512  ;;  %p1320_p5 = scmp.lt.s32.totalorder %s1627_s27, %s1318_s29 }
  0x75   : > { %p1315_p10 = pnand %p1313_p6, %p1269_p0  ;;  %p1321_p3 = scmp.lt.s32.totalorder %s1319_s0, %s1312_s30 }
  0x77   : > { %p1316_p4 = pneg %p1315_p10  ;;  %p1322_p7 = por %p1321_p3, %p1320_p5 }
  0x79   : > { %p1323_p9 = pnand %p1322_p7, %p1316_p4 }
  0x7b   : > { %1326 = shalt.err (!%p1323_p9)
}
  0x7c   : > { %1161 = dma.hbm_to_vmem [thread:$0]  (!%p1584_p11), %s1591_s9, 256, %s1627_s27, %s1630_s8, %s1772_s5, %s1772_s5, %s1771_s10  }
  0x7d   : > { %232 = sbr.rel (%p1481_p8) target bundleno = 942 (0x3ae), region = 36  ;;  %s1662_s7 = sand.u32 (!%p1481_p8), 1, %s1397_s16  }
  0x7e   : > { %s1665_s28 = sshll.u32 (!%p1481_p8), %s1662_s7, 4  ;;  %s235_s25 = scalar_lea.sflag (!%p1481_p8), [#allocation3], %s1662_s7 }
  0x7f   : > { %s238_s20 = scalar_lea.vmem (!%p1481_p8), [#allocation2], %s1665_s28  ;;  %p1773_p0 = scmp.ne.s32.totalorder (!%p1481_p8), %s1763_s21, 0 }
  0x84   : > { %1372 = dma.done.wait (%p1773_p0), %s235_s25, 256  }
  0x85   : > { %1374 = vsyncadd (%p1773_p0), %s235_s25, 4294967040  ;;  %s243_s23 = sand.u32 1, %s1462_s19   ;;  %s247_s27 = scalar_lea.vmem [#allocation5], %s1665_s28 }
  0x86   : > { %s244_s9 = scalar_lea.sflag [#allocation6], %s243_s23 }
  0x87   : > { %1376 = dma.done.wait (%p1773_p0), %s244_s9, 256  }
  0x88   : > { %1378 = vsyncadd (%p1773_p0), %s244_s9, 4294967040  ;;  %p1774_p8 = scmp.eq.s32.totalorder %s1462_s19, 0 }
  0x8a   : > { %1380 = dma.done.wait (%p1774_p8), [#allocation6], 768   ;;  %p1775_p11 = pmov %p1774_p8 }
  0x8b   : > { %p1776_p2 = pmov %p1774_p8 }
  0x8c   : > { %1382 = vsyncadd (%p1775_p11), [#allocation6], 4294966528 }
  0x8d   : > { %1384 = dma.done.wait (%p1776_p2), [#allocation9], 1536   ;;  %p1777_p12 = pmov %p1776_p2 }
  0x8e   : > { %v287_v0 = vld [vmem:[%s247_s27] sm:$0xff]  ;;  %v286_v2 = vld [vmem:[%s238_s20 + $0x8] sm:$0xff]  ;;  %vm325_vm0 = vcmask 130048   ;;  %vm502_vm1 = vcmask 261120   ;;  %s284_s21 = scalar_lea.vmem [#allocation10], %s1665_s28  ;;  %s1009_s5 = sshll.u32 %s1462_s19, 8 }
  0x8f   : > { %1386 = vsyncadd (%p1777_p12), [#allocation9], 4294965760  ;;  %289 = vxpose.xlu0.b32.start [1/2] (short) (narrow) %v287_v0, 16  ;;  %v285_v1 = vld [vmem:[%s238_s20] sm:$0xff]  ;;  %v288_v3 = vld [vmem:[%s247_s27 + $0x8] sm:$0xff]  ;;  %s858_s10 = sshll.u32 %s284_s21, 4  ;;  %s1704_s12 = scalar_lea.hbm %s1754_s4, %s1009_s5  ;;  %s1706_s10 = int_to_ptr.vmem [resolvable:$true] %s858_s10 }
  0x90   : > { %v1094_v4 = vpack.c.bf16 %v286_v2, %v285_v1  ;;  %v498_v5 = vld [vmem:[#allocation8 + $0x20] sm:$0xff]  ;;  %v499_v6 = vld [vmem:[#allocation8 + $0x28] sm:$0xff]  ;;  %v321_v11 = vld [vmem:[#allocation7] sm:$0xff]  ;;  %vm841_vm2 = vcmask 523264   ;;  %s845_s24 = scalar_lea.sflag [#allocation4], %s1662_s7  ;;  %s1327_s19 = scalar_lea.vmem %s1706_s10, 256 }
  0x91   : > { %v1102_v7 = vpack.c.bf16 %v499_v6, %v498_v5  ;;  %v407_v8 = vld [vmem:[#allocation8] sm:$0xff]  ;;  %v408_v9 = vld [vmem:[#allocation8 + $0x8] sm:$0xff]  ;;  %v322_v16 = vld [vmem:[#allocation7 + $0x8] sm:$0xff]  ;;  %p1328_p1 = scmp.ne.s32.totalorder %s1706_s10, %s1327_s19  ;;  %p1778_p13 = scmp.ne.s32.totalorder %s1768_s13, 0 }
  0x92   : > { %1095 = vmatprep.subr.bf16.mxu0 %v1094_v4  ;;  %1099 = vmatprep.subr.bf16.mxu1 %v1094_v4  ;;  %v1110_v10 = vpack.c.bf16 %v408_v9, %v407_v8  ;;  %v412_v12 = vld [vmem:[#allocation7 + $0x10] sm:$0xff]  ;;  %v413_v17 = vld [vmem:[#allocation7 + $0x18] sm:$0xff]  ;;  %v500_v18 = vld [vmem:[#allocation8 + $0x30] sm:$0xff]  ;;  %s1413_s30 = smov [#allocation10]  }
  0x93   : > { %290 = vxpose.xlu0.b32.end [2/2] (short) (narrow) %v288_v3, 16  ;;  %1097 = vmatpush3.bf16.msra.mxu0 %v1094_v4  ;;  %v501_v19 = vld [vmem:[#allocation8 + $0x38] sm:$0xff]  ;;  %v409_v20 = vld [vmem:[#allocation8 + $0x10] sm:$0xff]  ;;  %v752_v27 = vld [vmem:[#allocation8 + $0x40] sm:$0xff]  ;;  %p1329_p6 = pnand %p1328_p1, %p1778_p13  ;;  %s1331_s6 = sshll.u32 %s1413_s30, 4  ;;  %s1332_s6 = int_to_ptr.vmem [resolvable:$false] %s1331_s6 }
  0x94   : > { %1101 = vmatpush3.bf16.msra.mxu1 %v1094_v4  ;;  %1111 = vmatprep.subr.bf16.mxu0 %v1110_v10  ;;  %v410_v21 = vld [vmem:[#allocation8 + $0x18] sm:$0xff]  ;;  %v1106_v25 = vpack.c.bf16 %v501_v19, %v500_v18  ;;  %v753_v28 = vld [vmem:[#allocation8 + $0x48] sm:$0xff]  ;;  %v666_v30 = vld [vmem:[#allocation7 + $0x20] sm:$0xff]  ;;  %s1333_s29 = scalar_lea.vmem %s1332_s6, 512  ;;  %p1334_p4 = scmp.lt.s32.totalorder %s1706_s10, %s1332_s6 }
  0x95   : > { %1103 = vmatprep.subr.bf16.mxu1 %v1102_v7  ;;  %v1114_v26 = vpack.c.bf16 %v410_v21, %v409_v20  ;;  %v1122_v29 = vpack.c.bf16 %v753_v28, %v752_v27  ;;  %v667_v36 = vld [vmem:[#allocation7 + $0x28] sm:$0xff]  ;;  %v754_v38 = vld [vmem:[#allocation8 + $0x50] sm:$0xff]  ;;  %p1330_p10 = pneg %p1329_p6  ;;  %p1335_p5 = scmp.lt.s32.totalorder %s1333_s29, %s1327_s19 }
  0x96   : > { %v755_v39 = vld [vmem:[#allocation8 + $0x58] sm:$0xff] }
  0x97   : > { %v1126_v40 = vpack.c.bf16 %v755_v39, %v754_v38  ;;  %p1336_p3 = por %p1335_p5, %p1334_p4 }
  0x99   : > { %p1337_p7 = pnand %p1336_p3, %p1330_p10 }
 0x10f   : > { %v305_v13 = vpop.trf.xlu0 }
 0x110   : > { %v323_v14 = vmul.f32 %v321_v11, %v305_v13  ;;  %v414_v15 = vmul.f32 %v412_v12, %v305_v13  ;;  %v668_v35 = vmul.f32 %v666_v30, %v305_v13 }
 0x112   : > { %1044 = vmatprep.mubr.msk.f32.mxu0 %vm325_vm0, %v323_v14  ;;  %1051 = vmatprep.mubr.msk.f32.mxu1 %vm325_vm0, %v414_v15 }
 0x113   : > { %v306_v22 = vpop.trf.xlu0 }
 0x114   : > { %v324_v23 = vmul.f32 %v322_v16, %v306_v22  ;;  %v415_v24 = vmul.f32 %v413_v17, %v306_v22  ;;  %v669_v37 = vmul.f32 %v667_v36, %v306_v22 }
 0x116   : > { %1045 = vmatmul.mubr.msk.f32.vlgmr.msra.gmra.mrb[0].mxu0 %vm325_vm0, %v324_v23  ;;  %1052 = vmatmul.mubr.msk.f32.vlgmr.msra.gmra.mrb[0].mxu1 %vm325_vm0, %v415_v24 }
 0x117   : > { %1105 = vmatpush3.bf16.msra.mxu1 %v1102_v7  ;;  %1113 = vmatpush3.bf16.msra.mxu0 %v1110_v10 }
 0x118   : > { %1107 = vmatprep.subr.bf16.mxu1 %v1106_v25  ;;  %1115 = vmatprep.subr.bf16.mxu0 %v1114_v26 }
 0x11b   : > { %1109 = vmatpush3.bf16.msra.mxu1 %v1106_v25  ;;  %1117 = vmatpush3.bf16.msra.mxu0 %v1114_v26 }
 0x11c   : > { %1119 = vmatprep.subr.bf16.mxu1 %v1094_v4  ;;  %1123 = vmatprep.subr.bf16.mxu0 %v1122_v29 }
 0x1e9   : > { %v1046_v31 = vpop.f32.mrb[0].mxu0  ;;  %v1053_v32 = vpop.f32.mrb[0].mxu1 }
 0x1ea   : > { %v398_v33 = vpop.f32.mrb[1].mxu0  ;;  %v488_v34 = vpop.f32.mrb[1].mxu1 }
 0x1eb   : > { %1062 = vmatprep.mubr.msk.f32.mxu1 %vm502_vm1, %v488_v34  ;;  %1073 = vmatprep.mubr.msk.f32.mxu0 %vm502_vm1, %v398_v33 }
 0x1ec   : > { %1063 = vmatmul.mubr.msk.f32.vlgmr.msra.gmra.mrb[2].mxu1 %vm502_vm1, %v1053_v32  ;;  %1074 = vmatmul.mubr.msk.f32.vlgmr.msra.gmra.mrb[2].mxu0 %vm502_vm1, %v1046_v31 }
 0x1ed   : > { %1121 = vmatpush3.bf16.msra.mxu1 %v1094_v4  ;;  %1080 = vmatprep.mubr.msk.f32.mxu1 %vm325_vm0, %v668_v35 }
 0x1ee   : > { %1125 = vmatpush3.bf16.msra.mxu0 %v1122_v29 }
 0x1ef   : > { %1127 = vmatprep.subr.bf16.mxu0 %v1126_v40 }
 0x1f0   : > { %1081 = vmatmul.mubr.msk.f32.vlgmr.msra.gmra.mrb[4].mxu1 %vm325_vm0, %v669_v37 }
 0x1f2   : > { %1129 = vmatpush3.bf16.msra.mxu0 %v1126_v40 }
 0x2bf   : > { %v1064_v41 = vpop.f32.mrb[2].mxu1 }
 0x2c0   : > { %v575_v42 = vpop.f32.mrb[3].mxu1 }
 0x2c3   : > { %v1082_v43 = vpop.f32.mrb[4].mxu1 }
 0x2c4   : > { %v742_v44 = vpop.f32.mrb[5].mxu1 }
 0x2c5   : > { %1091 = vmatprep.mubr.msk.f32.mxu0 %vm502_vm1, %v742_v44 }
 0x2c6   : > { %1092 = vmatmul.mubr.msk.f32.vlgmr.msra.gmra.mrb[2].mxu0 %vm502_vm1, %v1082_v43 }
 0x399   : > { %v1093_v45 = vpop.f32.mrb[2].mxu0 }
 0x39a   : > { %v1130_v46 = vadd.f32 %v1093_v45, %v1064_v41  ;;  %v828_v47 = vpop.f32.mrb[3].mxu0 }
 0x39b   : > { %v1131_v48 = vadd.f32 %v828_v47, %v575_v42 }
 0x39c   : > { %v840_v49 = vmax.f32 %v1130_v46, 0.0 }
 0x39d   : > { %v839_v50 = vmax.f32 %v1131_v48, 0.0 }
 0x39e   : > { %843 = vst.msk [vmem:[%s284_s21 + $0x8] sm:$0xff] %vm841_vm2, %v840_v49 }
 0x39f   : > { %842 = vst.msk [vmem:[%s284_s21] sm:$0xff] %vm841_vm2, %v839_v50 }
 0x3a0   : > { %1340 = shalt.err (!%p1337_p7)
}
 0x3a1   : > { %s1341_s0 = scalar_lea.hbm %s1704_s12, 256  ;;  %s1345_s20 = scalar_lea.hbm %s1754_s4, 512 }
 0x3a2   : > { %p1342_p9 = scmp.ne.s32.totalorder %s1704_s12, %s1341_s0  ;;  %p1346_p11 = scmp.lt.u32.totalorder %s1704_s12, %s1754_s4 }
 0x3a3   : > { %p1347_p2 = scmp.lt.u32.totalorder %s1345_s20, %s1341_s0  ;;  %p1349_p1 = scmp.lt.u32.totalorder %s1341_s0, %s1704_s12 }
 0x3a4   : > { %p1343_p0 = pnand %p1342_p9, %p1778_p13 }
 0x3a5   : > { %p1348_p12 = por %p1347_p2, %p1346_p11 }
 0x3a6   : > { %p1344_p8 = pneg %p1343_p0 }
 0x3a7   : > { %p1350_p6 = por %p1349_p1, %p1348_p12 }
 0x3a9   : > { %p1351_p10 = pnand %p1350_p6, %p1344_p8 }
 0x3ab   : > { %1354 = shalt.err (!%p1351_p10)
}
 0x3ac   : > { %s1414_s27 = smov 128   ;;  %s1415_s21 = smov 8  }
 0x3ad   : > { %1146 = dma.vmem_to_hbm [thread:$0]  (%p1778_p13), %s1706_s10, 256, %s1704_s12, %s845_s24, %s1414_s27, %s1414_s27, %s1415_s21  }
 0x3ae PF: > { %s873_s5 = sand.u32 1, %s1393_s15   ;;  %p1779_p4 = scmp.ne.s32.totalorder %s1764_s22, 0 }
 0x3af   : > { %p1780_p5 = scmp.ge.s32.totalorder %s1405_s18, 2  ;;  %s874_s8 = scalar_lea.sflag [#allocation4], %s873_s5 }
 0x3b1   : > { %p1163_p3 = pnand %p1780_p5, %p1779_p4 }
 0x3b3   : > { %1388 = dma.done.wait (!%p1163_p3), %s874_s8, 256  }
 0x3b4   : > { %1390 = vsyncadd (!%p1163_p3), %s874_s8, 4294967040  ;;  %p21_p7 = scmp.ge.s32.totalorder %s1557_s26, 4   ;;  %s1781_s15 = smov %s1397_s16 }
 0x3b5   : > { %s1782_s16 = smov %s1401_s17  ;;  %s1783_s17 = smov %s1573_s14 }
 0x3b6   : > { %s1784_s18 = smov %s1557_s26  ;;  %23 = sbr.rel (!%p21_p7) target bundleno = 10 (0xa), region = 106 }
 0x3bd   :  { %879 = vsyncpa [#allocation3], 1 }
 0x3be   :  { %881 = vsyncpa [#allocation3 + $0x1], 1 }
 0x3bf   :  { %882 = vsyncpa [#allocation6], 1 }
 0x3c0   :  { %884 = vsyncpa [#allocation6 + $0x1], 1 }
 0x3c1   :  { %885 = vsyncpa [#allocation9], 1 }
 0x3c2   :  { %886 = vsyncpa [#allocation4], 1 }
 0x3c3   :  { %888 = vsyncpa [#allocation4 + $0x1], 1 }

</bundles_post_ra>
